<compile_context>
chip_gen: v6e
topology: v6e:2x2x1
jax: 0.10.0
libtpu: 0.0.40
codegen_flags: <defaults>
</compile_context>

<pallas_src>
import jax
import jax.numpy as jnp
from jax import lax
from jax.experimental import pallas as pl
from jax.experimental.pallas import tpu as pltpu

VOCAB_SIZE = 32
EMBEDDING_DIM = 64
CONTEXT_SIZE = 2
HIDDEN = 128

VOCAB_PAD = 128        # lane-dense vocab (multiple of 128) for the folded weight
MAX_TILE_B = 512       # upper bound on batch rows per grid step (sweepable)


def ngram_lm_kernel(tok_ref,   # VMEM (TILE_B, CONTEXT_SIZE) int32
                    m_ref,     # VMEM (CONTEXT_SIZE*VOCAB_PAD, HIDDEN)  bf16/f32
                    b1_ref,    # VMEM (1, HIDDEN) f32
                    w2_ref,    # VMEM (HIDDEN, VOCAB_PAD) bf16/f32
                    b2_ref,    # VMEM (1, VOCAB_PAD) f32  (padded lanes = -1e30)
                    out_ref):  # VMEM (TILE_B, VOCAB_SIZE) f32
    tile_b, context = tok_ref.shape
    ce_pad = m_ref.shape[0]                 # CONTEXT_SIZE * VOCAB_PAD
    vocab_pad = ce_pad // context
    cdt = m_ref.dtype                       # bf16 (default) or f32

    tokens = tok_ref[...]                                          # (TILE_B, C)

    # Concatenated one-hot built directly in the MXU operand dtype.
    # one_hot[b, c*VOCAB_PAD + v] = 1 iff tokens[b, c] == v   (exact in bf16;
    # an id >= vocab selects a zero row of M -> inherently OOB-safe).
    lane_iota = lax.broadcasted_iota(jnp.int32, (tile_b, ce_pad), 1)
    one_hot = jnp.zeros((tile_b, ce_pad), cdt)
    for i in range(context):                                        # tiny static unroll
        one_hot = one_hot + (lane_iota == tokens[:, i:i + 1] + i * vocab_pad).astype(cdt)

    # Embedding gather + linear1 as a single folded MXU matmul, then bias+ReLU.
    hidden = jnp.dot(one_hot, m_ref[...],
                     preferred_element_type=jnp.float32) + b1_ref[...]
    hidden = jnp.maximum(hidden, 0.0).astype(cdt)                   # (TILE_B, HIDDEN)

    # linear2 over the lane-dense padded vocab; padded lanes already carry
    # -1e30 via b2 (w2 padded columns are zero), so no explicit mask is needed.
    logits = jnp.dot(hidden, w2_ref[...],
                     preferred_element_type=jnp.float32) + b2_ref[...]

    # Numerically stable log_softmax along the lane axis.
    m = jnp.max(logits, axis=-1, keepdims=True)
    z = logits - m
    lse = jnp.log(jnp.sum(jnp.exp(z), axis=-1, keepdims=True))

    # Store only the real vocab lanes (masked vst; 4x less HBM write traffic,
    # and the store slot is nowhere near the bottleneck here).
    out_ref[...] = (z - lse)[:, :out_ref.shape[-1]]


def _choose_tile_b(batch, max_tile=MAX_TILE_B):
    """Largest tile <= max_tile that keeps the grid >= 2 (v7x megacore),
    rounded to a sublane multiple of 8."""
    half = -(-batch // 2)            # cdiv(batch, 2)
    half = -(-half // 8) * 8         # round up to multiple of 8
    return max(8, min(max_tile, half))


def ngram_lm_forward(tokens, emb, w1, b1, w2, b2, *, tile_b=None, use_bf16=True):
    """tokens: (B, CONTEXT_SIZE) or (CONTEXT_SIZE,) int32 -> (B, VOCAB_SIZE).

    Row b equals NGramLanguageModeler.forward(tokens[b]) of the PyTorch module.
    use_bf16=True feeds bf16 operands to the MXU (f32 accumulation); set
    use_bf16=False for bit-for-bit-ish f32 verification.
    """
    tokens = jnp.asarray(tokens, jnp.int32)
    if tokens.ndim == 1:
        tokens = tokens[None, :]
    batch, context = tokens.shape
    assert context == CONTEXT_SIZE

    emb = jnp.asarray(emb, jnp.float32).reshape(VOCAB_SIZE, EMBEDDING_DIM)
    w1 = jnp.asarray(w1, jnp.float32).reshape(CONTEXT_SIZE * EMBEDDING_DIM, HIDDEN)
    b1 = jnp.asarray(b1, jnp.float32).reshape(1, HIDDEN)      # accepts (H,) or (1,H)
    w2 = jnp.asarray(w2, jnp.float32).reshape(HIDDEN, VOCAB_SIZE)
    b2 = jnp.asarray(b2, jnp.float32).reshape(1, VOCAB_SIZE)

    if tile_b is None:
        tile_b = _choose_tile_b(batch)
    b_pad = pl.cdiv(batch, tile_b) * tile_b
    if b_pad != batch:
        # Padded rows use token 0 and are sliced off below.
        tokens = jnp.pad(tokens, ((0, b_pad - batch), (0, 0)))
    n_tiles = b_pad // tile_b

    # Fold embedding @ linear1:  M[c*VOCAB_PAD + v, :] = emb_pad[v] @ W1[c]
    emb_p = jnp.zeros((VOCAB_PAD, EMBEDDING_DIM), jnp.float32).at[:VOCAB_SIZE].set(emb)
    w1_r = w1.reshape(CONTEXT_SIZE, EMBEDDING_DIM, HIDDEN)
    m_fold = jnp.einsum('ve,ceh->cvh', emb_p, w1_r).reshape(
        CONTEXT_SIZE * VOCAB_PAD, HIDDEN)

    # Lane-dense w2; mask for the padded vocab lanes folded into the bias.
    w2_p = jnp.zeros((HIDDEN, VOCAB_PAD), jnp.float32).at[:, :VOCAB_SIZE].set(w2)
    b2_p = jnp.full((1, VOCAB_PAD), -1e30, jnp.float32).at[:, :VOCAB_SIZE].set(b2)

    wdt = jnp.bfloat16 if use_bf16 else jnp.float32
    m_fold = m_fold.astype(wdt)
    w2_p = w2_p.astype(wdt)

    # Weight specs return block 0 for every grid step -> resident in VMEM
    # (Pallas skips re-DMA when the block index is unchanged).
    resident = lambda shape: pl.BlockSpec(shape, lambda b, _n=len(shape): (0,) * _n)

    out = pl.pallas_call(
        ngram_lm_kernel,
        out_shape=jax.ShapeDtypeStruct((b_pad, VOCAB_SIZE), jnp.float32),
        grid_spec=pltpu.PrefetchScalarGridSpec(
            num_scalar_prefetch=0,
            grid=(n_tiles,),
            in_specs=[
                pl.BlockSpec((tile_b, CONTEXT_SIZE), lambda b: (b, 0)),
                resident((CONTEXT_SIZE * VOCAB_PAD, HIDDEN)),
                resident((1, HIDDEN)),
                resident((HIDDEN, VOCAB_PAD)),
                resident((1, VOCAB_PAD)),
            ],
            out_specs=pl.BlockSpec((tile_b, VOCAB_SIZE), lambda b: (b, 0)),
        ),
        # Batch axis "parallel": v7x's two TensorCores split the tiles
        # (no-op on v5e/v6e). VMEM footprint at tile_b=512 is a few MiB,
        # well under the scoped default, so no vmem_limit_bytes override.
        compiler_params=pltpu.CompilerParams(
            dimension_semantics=("parallel",)),
    )(tokens, m_fold, b1, w2_p, b2_p)

    return out[:batch] if b_pad != batch else out


def reference_forward(tokens, emb, w1, b1, w2, b2):
    embeds = emb[tokens].reshape(tokens.shape[0], -1)        # (B, C*E)
    h = jnp.maximum(embeds @ w1 + b1, 0.0)
    logits = h @ w2 + b2
    return jax.nn.log_softmax(logits, axis=-1)


if __name__ == "__main__":
    key = jax.random.PRNGKey(0)
    k_emb, k_w1, k_b1, k_w2, k_b2, k_in = jax.random.split(key, 6)

    # Deterministic synthetic parameters (shapes from the module's __init__),
    # with PyTorch-style 1-D biases to exercise the wrapper reshape.
    emb = jax.random.normal(k_emb, (VOCAB_SIZE, EMBEDDING_DIM), jnp.float32)
    w1 = jax.random.normal(k_w1, (CONTEXT_SIZE * EMBEDDING_DIM, HIDDEN), jnp.float32) * 0.05
    b1 = jax.random.normal(k_b1, (HIDDEN,), jnp.float32) * 0.05
    w2 = jax.random.normal(k_w2, (HIDDEN, VOCAB_SIZE), jnp.float32) * 0.05
    b2 = jax.random.normal(k_b2, (VOCAB_SIZE,), jnp.float32) * 0.05

    # A batch of context windows (deliberately not a multiple of the tile to
    # exercise the batch-padding path; tile auto-chooses 104 -> grid of 2).
    B = 200
    tokens = jax.random.randint(k_in, (B, CONTEXT_SIZE), 0, VOCAB_SIZE, jnp.int32)

    ref = reference_forward(tokens, emb, w1, b1, w2, b2)

    # f32 verification path: matches the module to f32 accuracy.
    out_f32 = jax.block_until_ready(
        ngram_lm_forward(tokens, emb, w1, b1, w2, b2, use_bf16=False))
    assert out_f32.shape == (B, VOCAB_SIZE)
    err_f32 = float(jnp.max(jnp.abs(out_f32 - ref)))
    assert jnp.allclose(out_f32, ref, atol=1e-4, rtol=1e-4), err_f32

    # Default fast path: bf16 MXU operands, f32 accumulation.
    out_bf16 = jax.block_until_ready(ngram_lm_forward(tokens, emb, w1, b1, w2, b2))
    assert out_bf16.shape == (B, VOCAB_SIZE)
    err_bf16 = float(jnp.max(jnp.abs(out_bf16 - ref)))
    assert jnp.allclose(out_bf16, ref, atol=5e-2, rtol=5e-2), err_bf16

    # Single-context path, exactly like the PyTorch module's (1, vocab) output.
    single = jax.block_until_ready(
        ngram_lm_forward(tokens[0], emb, w1, b1, w2, b2, use_bf16=False))
    assert single.shape == (1, VOCAB_SIZE)
    assert jnp.allclose(single, ref[0:1], atol=1e-4, rtol=1e-4)

    print("KERNEL_OK")
</pallas_src>

<mosaic_0001>
module attributes {stable_mosaic.version = 11 : i64} {
  func.func @ngram_lm_kernel(%arg0: i32, %arg1: memref<104x2xi32, #tpu.memory_space<vmem>>, %arg2: memref<256x128xf32, #tpu.memory_space<vmem>>, %arg3: memref<1x128xf32, #tpu.memory_space<vmem>>, %arg4: memref<128x128xf32, #tpu.memory_space<vmem>>, %arg5: memref<1x128xf32, #tpu.memory_space<vmem>>, %arg6: memref<104x32xf32, #tpu.memory_space<vmem>>) attributes {dimension_semantics = [#tpu.dimension_semantics<parallel>], iteration_bounds = array<i64: 2>, scalar_prefetch = 0 : i64, scratch_operands = 0 : i64, tpu.core_type = #tpu.core_type<tc>, window_params = [{transform_indices = @transform_0, window_bounds = array<i64: 104, 2>}, {pipeline_mode = #tpu.pipeline_mode<synchronous>, transform_indices = @transform_1, window_bounds = array<i64: 256, 128>}, {pipeline_mode = #tpu.pipeline_mode<synchronous>, transform_indices = @transform_2, window_bounds = array<i64: 1, 128>}, {pipeline_mode = #tpu.pipeline_mode<synchronous>, transform_indices = @transform_3, window_bounds = array<i64: 128, 128>}, {pipeline_mode = #tpu.pipeline_mode<synchronous>, transform_indices = @transform_4, window_bounds = array<i64: 1, 128>}, {transform_indices = @transform_5, window_bounds = array<i64: 104, 32>}]} {
    %c0 = arith.constant 0 : index
    %c0_0 = arith.constant 0 : index
    %0 = vector.load %arg1[%c0, %c0_0] : memref<104x2xi32, #tpu.memory_space<vmem>>, vector<104x2xi32>
    %1 = tpu.iota {dimensions = array<i32: 1>} : vector<104x256xi32>
    %cst = arith.constant 0.000000e+00 : f32
    %2 = vector.broadcast %cst : f32 to vector<104x256xf32>
    %3 = vector.extract_strided_slice %0 {offsets = [0, 0], sizes = [104, 1], strides = [1, 1]} : vector<104x2xi32> to vector<104x1xi32>
    %c0_i32 = arith.constant 0 : i32
    %4 = vector.broadcast %c0_i32 : i32 to vector<104x1xi32>
    %5 = arith.addi %3, %4 : vector<104x1xi32>
    %6 = vector.broadcast %5 : vector<104x1xi32> to vector<104x256xi32>
    %7 = arith.cmpi eq, %1, %6 : vector<104x256xi32>
    %8 = arith.extui %7 : vector<104x256xi1> to vector<104x256xi32>
    %9 = arith.sitofp %8 : vector<104x256xi32> to vector<104x256xf32>
    %10 = arith.addf %2, %9 : vector<104x256xf32>
    %11 = vector.extract_strided_slice %0 {offsets = [0, 1], sizes = [104, 1], strides = [1, 1]} : vector<104x2xi32> to vector<104x1xi32>
    %c128_i32 = arith.constant 128 : i32
    %12 = vector.broadcast %c128_i32 : i32 to vector<104x1xi32>
    %13 = arith.addi %11, %12 : vector<104x1xi32>
    %14 = vector.broadcast %13 : vector<104x1xi32> to vector<104x256xi32>
    %15 = arith.cmpi eq, %1, %14 : vector<104x256xi32>
    %16 = arith.extui %15 : vector<104x256xi1> to vector<104x256xi32>
    %17 = arith.sitofp %16 : vector<104x256xi32> to vector<104x256xf32>
    %18 = arith.addf %10, %17 : vector<104x256xf32>
    %c0_1 = arith.constant 0 : index
    %c0_2 = arith.constant 0 : index
    %19 = vector.load %arg2[%c0_1, %c0_2] : memref<256x128xf32, #tpu.memory_space<vmem>>, vector<256x128xf32>
    %cst_3 = arith.constant dense<0.000000e+00> : vector<104x128xf32>
    %20 = tpu.matmul %18, %19, %cst_3 {dimension_numbers = #tpu.dot_dimension_numbers<[1], [0], [0], [1], [0, 0, 1, 1], [], []>} : vector<104x256xf32>, vector<256x128xf32>, vector<104x128xf32> -> vector<104x128xf32>
    %c0_4 = arith.constant 0 : index
    %c0_5 = arith.constant 0 : index
    %21 = vector.load %arg3[%c0_4, %c0_5] : memref<1x128xf32, #tpu.memory_space<vmem>>, vector<1x128xf32>
    %22 = vector.broadcast %21 : vector<1x128xf32> to vector<104x128xf32>
    %23 = arith.addf %20, %22 : vector<104x128xf32>
    %cst_6 = arith.constant 0.000000e+00 : f32
    %24 = vector.broadcast %cst_6 : f32 to vector<104x128xf32>
    %25 = arith.maximumf %23, %24 : vector<104x128xf32>
    %c0_7 = arith.constant 0 : index
    %c0_8 = arith.constant 0 : index
    %26 = vector.load %arg4[%c0_7, %c0_8] : memref<128x128xf32, #tpu.memory_space<vmem>>, vector<128x128xf32>
    %cst_9 = arith.constant dense<0.000000e+00> : vector<104x128xf32>
    %27 = tpu.matmul %25, %26, %cst_9 {dimension_numbers = #tpu.dot_dimension_numbers<[1], [0], [0], [1], [0, 0, 1, 1], [], []>} : vector<104x128xf32>, vector<128x128xf32>, vector<104x128xf32> -> vector<104x128xf32>
    %c0_10 = arith.constant 0 : index
    %c0_11 = arith.constant 0 : index
    %28 = vector.load %arg5[%c0_10, %c0_11] : memref<1x128xf32, #tpu.memory_space<vmem>>, vector<1x128xf32>
    %29 = vector.broadcast %28 : vector<1x128xf32> to vector<104x128xf32>
    %30 = arith.addf %27, %29 : vector<104x128xf32>
    %cst_12 = arith.constant dense<0xFF800000> : vector<104xf32>
    %31 = vector.multi_reduction <maximumf>, %30, %cst_12 [1] : vector<104x128xf32> to vector<104xf32>
    %32 = vector.shape_cast %31 : vector<104xf32> to vector<104x1xf32>
    %33 = vector.broadcast %32 : vector<104x1xf32> to vector<104x128xf32>
    %34 = arith.subf %30, %33 : vector<104x128xf32>
    %35 = math.exp %34 : vector<104x128xf32>
    %cst_13 = arith.constant dense<0.000000e+00> : vector<104xf32>
    %36 = vector.multi_reduction <add>, %35, %cst_13 [1] : vector<104x128xf32> to vector<104xf32>
    %37 = vector.shape_cast %36 : vector<104xf32> to vector<104x1xf32>
    %38 = math.log %37 : vector<104x1xf32>
    %39 = vector.broadcast %38 : vector<104x1xf32> to vector<104x128xf32>
    %40 = arith.subf %34, %39 : vector<104x128xf32>
    %41 = vector.extract_strided_slice %40 {offsets = [0, 0], sizes = [104, 32], strides = [1, 1]} : vector<104x128xf32> to vector<104x32xf32>
    %c0_14 = arith.constant 0 : index
    %c0_15 = arith.constant 0 : index
    %42 = vector.load %arg6[%c0_14, %c0_15] : memref<104x32xf32, #tpu.memory_space<vmem>>, vector<104x32xf32>
    tpu.vector_store %arg6[%c0_14, %c0_15], %41 {strides = array<i32>} : memref<104x32xf32, #tpu.memory_space<vmem>>, vector<104x32xf32>,
    return
  }
  func.func @transform_0(%arg0: i32) -> (i32, i32) {
    %c0_i32 = arith.constant 0 : i32
    %c0_i32_0 = arith.constant 0 : i32
    return %arg0, %c0_i32 : i32, i32
  }
  func.func @transform_1(%arg0: i32) -> (i32, i32) {
    %c0_i32 = arith.constant 0 : i32
    %c0_i32_0 = arith.constant 0 : i32
    %c0_i32_1 = arith.constant 0 : i32
    return %c0_i32, %c0_i32_0 : i32, i32
  }
  func.func @transform_2(%arg0: i32) -> (i32, i32) {
    %c0_i32 = arith.constant 0 : i32
    %c0_i32_0 = arith.constant 0 : i32
    %c0_i32_1 = arith.constant 0 : i32
    return %c0_i32, %c0_i32_0 : i32, i32
  }
  func.func @transform_3(%arg0: i32) -> (i32, i32) {
    %c0_i32 = arith.constant 0 : i32
    %c0_i32_0 = arith.constant 0 : i32
    %c0_i32_1 = arith.constant 0 : i32
    return %c0_i32, %c0_i32_0 : i32, i32
  }
  func.func @transform_4(%arg0: i32) -> (i32, i32) {
    %c0_i32 = arith.constant 0 : i32
    %c0_i32_0 = arith.constant 0 : i32
    %c0_i32_1 = arith.constant 0 : i32
    return %c0_i32, %c0_i32_0 : i32, i32
  }
  func.func @transform_5(%arg0: i32) -> (i32, i32) {
    %c0_i32 = arith.constant 0 : i32
    %c0_i32_0 = arith.constant 0 : i32
    return %arg0, %c0_i32 : i32, i32
  }
}

</mosaic_0001>

<bundles_post_ra>
// kernel: tpu_custom_call.1
= control target key start
LH: loop header
LB: loop body
LE: loop exit
PB: predicated region body
PF: predicated region fallthrough
CT: control target
= control target key end

     0   :  { %10 = vsyncpa [#allocation3], 0  ;;  %s1498_s18 = smov 0   ;;  %s1870_s0 = inlined_call_operand.vmem [shape: s32[208,2], index: 0, kind: input, shape index: {}]   ;;  %s1871_s1 = inlined_call_operand.hbm [shape: f32[256,128], index: 1, kind: input, shape index: {}]   ;;  %s1872_s2 = inlined_call_operand.vmem [shape: f32[1,128], index: 2, kind: input, shape index: {}]   ;;  %s1873_s3 = inlined_call_operand.vmem [shape: f32[128,128], index: 3, kind: input, shape index: {}]   ;;  %s1874_s4 = inlined_call_operand.vmem [shape: f32[1,128], index: 4, kind: input, shape index: {}]   ;;  %s1875_s5 = inlined_call_operand.vmem [shape: f32[208,32], index: 5, kind: output, shape index: {}]  }
   0x1 LB: > { %s1105_s19 = sadd.s32 4294967295, %s1459_s18   ;;  %p1107_p0 = scmp.ge.s32.totalorder %s1459_s18, 1  ;;  %s1459_s18 = sphi %s1498_s18, %s16_s18  }
   0x2   : > { %p157_p1 = scmp.lt.s32.totalorder %s1459_s18, 3  ;;  %s1461_s20 = smov [#allocation2]  }
   0x3   : > { %s169_s21 = sshll.u32 %s1461_s20, 4  ;;  %p1510_p3 = scmp.eq.s32.totalorder %s1105_s19, 0  ;;  %s170_s21 = int_to_ptr.vmem [resolvable:$true] %s169_s21 }
   0x4   : > { %p1506_p2 = pnand %p1107_p0, %p157_p1  ;;  %s1434_s24 = scalar_lea.vmem %s170_s21, 4096 }
   0x5   : > { %p1435_p7 = scmp.ne.s32.totalorder %s170_s21, %s1434_s24  ;;  %p1442_p10 = scmp.lt.s32.totalorder %s170_s21, %s170_s21 }
   0x6   : > { %p1345_p4 = pneg %p1506_p2  ;;  %p1443_p11 = scmp.lt.s32.totalorder %s1434_s24, %s1434_s24 }
   0x8   : > { %p1346_p5 = pnand %p1510_p3, %p1345_p4  ;;  %p1444_p12 = por %p1443_p11, %p1442_p10 }
   0xa   : > { %p1425_p6 = pneg %p1346_p5 }
   0xc   : > { %p1437_p8 = pnand %p1435_p7, %p1425_p6 }
   0xe   : > { %p1438_p9 = pneg %p1437_p8 }
  0x10   : > { %p1445_p13 = pnand %p1444_p12, %p1438_p9 }
  0x12   : > { %1448 = shalt.err (!%p1445_p13)
}
  0x13   : > { %s1462_s25 = smov 128   ;;  %s1463_s26 = smov 8  }
  0x14   : > { %1348 = dma.hbm_to_vmem [thread:$0]  (!%p1346_p5), %s1871_s1, 4096, %s170_s21, [#allocation3], %s1462_s25, %s1462_s25, %s1463_s26  }
  0x15   : > { %203 = sbr.rel (%p1506_p2) target bundleno = 926 (0x39e), region = 40 }
  0x1a   : > { %1454 = dma.done.wait (%p1510_p3), [#allocation3], 4096  }
  0x1b   : > { %1456 = vsyncadd (%p1510_p3), [#allocation3], 4294963200  ;;  %s231_s29 = smul.u32 13, %s1105_s19  ;;  %v1464_v0 = vmov 0   ;;  %v1465_v1 = vmov 0.0   ;;  %v589_v2 = vld [vmem:[#allocation2 + $0xf8] sm:$0xff] }
  0x1c   : > { %1368 = vset.pattern.permute.xlu1 %v1464_v0  ;;  %1366 = vset.pattern.permute.xlu0 %v1464_v0  ;;  %v573_v3 = vld [vmem:[#allocation2 + $0x78] sm:$0xff]  ;;  %v588_v6 = vld [vmem:[#allocation2 + $0xf0] sm:$0xff]  ;;  %v1466_v11 = vmov 1   ;;  %v587_v12 = vld [vmem:[#allocation2 + $0xe8] sm:$0xff] }
  0x1d   : > { %p232_p0 = scmp.lt.s32.totalorder %s231_s29, 25  ;;  %1270 = vmatprep.subr.mxu1 %v1465_v1  ;;  %1170 = vmatprep.subr.mxu0 %v589_v2  ;;  %v572_v10 = vld [vmem:[#allocation2 + $0x70] sm:$0xff]  ;;  %v571_v14 = vld [vmem:[#allocation2 + $0x68] sm:$0xff]  ;;  %v586_v16 = vld [vmem:[#allocation2 + $0xe0] sm:$0xff] }
  0x1e   : > { %1171 = vmatpush3.msra.mxu0 %v573_v3  ;;  %v570_v17 = vld [vmem:[#allocation2 + $0x60] sm:$0xff]  ;;  %v585_v19 = vld [vmem:[#allocation2 + $0xd8] sm:$0xff]  ;;  %v584_v22 = vld [vmem:[#allocation2 + $0xd0] sm:$0xff] }
  0x1f   : > { %s1879_s29 = smov (!%p232_p0, %s231_s29), 25  ;;  %1172 = vmatprep.subr.mxu0 %v588_v6  ;;  %v569_v21 = vld [vmem:[#allocation2 + $0x58] sm:$0xff]  ;;  %v568_v23 = vld [vmem:[#allocation2 + $0x50] sm:$0xff]  ;;  %v583_v25 = vld [vmem:[#allocation2 + $0xc8] sm:$0xff] }
  0x20   : > { %s1112_s30 = sshll.u32 %s1879_s29, 3  ;;  %1173 = vmatpush3.msra.mxu0 %v572_v10  ;;  %v567_v27 = vld [vmem:[#allocation2 + $0x48] sm:$0xff]  ;;  %v582_v28 = vld [vmem:[#allocation2 + $0xc0] sm:$0xff]  ;;  %v581_v31 = vld [vmem:[#allocation2 + $0xb8] sm:$0xff] }
  0x21   : > { %s1536_s8 = scalar_lea.vmem %s1870_s0, %s1112_s30  ;;  %1174 = vmatprep.subr.mxu0 %v587_v12  ;;  %v566_v29 = vld [vmem:[#allocation2 + $0x40] sm:$0xff]  ;;  %v565_v33 = vld [vmem:[#allocation2 + $0x38] sm:$0xff]  ;;  %v580_v34 = vld [vmem:[#allocation2 + $0xb0] sm:$0xff]  ;;  %s1826_s26 = scalar_lea.vmem %s1875_s5, %s1112_s30 }
  0x22   : > { %v244_v4 = vld [vmem:[%s1536_s8 + $0x8] sm:$0xff]  ;;  %v243_v5 = vld [vmem:[%s1536_s8] sm:$0xff]  ;;  %v245_v9 = vld [vmem:[%s1536_s8 + $0x10] sm:$0xff]  ;;  %1175 = vmatpush3.msra.mxu0 %v571_v14 }
  0x23   : > { %263 = vperm.xlu1 %1368, %v244_v4   ;;  %260 = vperm.xlu0 %1366, %v243_v5   ;;  %v403_v7 = vadd.s32 128, %v244_v4  ;;  %v402_v8 = vadd.s32 128, %v243_v5  ;;  %v404_v13 = vadd.s32 128, %v245_v9  ;;  %v246_v15 = vld [vmem:[%s1536_s8 + $0x18] sm:$0xff]  ;;  %v247_v20 = vld [vmem:[%s1536_s8 + $0x20] sm:$0xff]  ;;  %v248_v26 = vld [vmem:[%s1536_s8 + $0x28] sm:$0xff] }
  0x24   : > { %v405_v18 = vadd.s32 128, %v246_v15  ;;  %1176 = vmatprep.subr.mxu0 %v586_v16  ;;  %v406_v24 = vadd.s32 128, %v247_v20  ;;  %v407_v30 = vadd.s32 128, %v248_v26  ;;  %v249_v32 = vld [vmem:[%s1536_s8 + $0x30] sm:$0xff]  ;;  %v579_v37 = vld [vmem:[#allocation2 + $0xa8] sm:$0xff]  ;;  %v250_v38 = vld [vmem:[%s1536_s8 + $0x38] sm:$0xff] }
  0x25   : > { %1177 = vmatpush3.msra.mxu0 %v570_v17  ;;  %v564_v35 = vld [vmem:[#allocation2 + $0x30] sm:$0xff]  ;;  %v408_v36 = vadd.s32 128, %v249_v32  ;;  %v563_v39 = vld [vmem:[#allocation2 + $0x28] sm:$0xff]  ;;  %v578_v40 = vld [vmem:[#allocation2 + $0xa0] sm:$0xff]  ;;  %v409_v42 = vadd.s32 128, %v250_v38 }
  0x26   : > { %1178 = vmatprep.subr.mxu0 %v585_v19  ;;  %v562_v41 = vld [vmem:[#allocation2 + $0x20] sm:$0xff]  ;;  %v577_v43 = vld [vmem:[#allocation2 + $0x98] sm:$0xff]  ;;  %v576_v46 = vld [vmem:[#allocation2 + $0x90] sm:$0xff] }
  0x27   : > { %1369 = vset.pattern.permute.xlu1 %v1466_v11  ;;  %1367 = vset.pattern.permute.xlu0 %v1466_v11  ;;  %v251_v44 = vld [vmem:[%s1536_s8 + $0x40] sm:$0xff]  ;;  %v561_v45 = vld [vmem:[#allocation2 + $0x18] sm:$0xff]  ;;  %v560_v47 = vld [vmem:[#allocation2 + $0x10] sm:$0xff] }
  0x28   : > { %419 = vperm.xlu1 %1369, %v403_v7   ;;  %416 = vperm.xlu0 %1367, %v402_v8   ;;  %v410_v48 = vadd.s32 128, %v251_v44  ;;  %v575_v49 = vld [vmem:[#allocation2 + $0x88] sm:$0xff]  ;;  %v574_v52 = vld [vmem:[#allocation2 + $0x80] sm:$0xff]  ;;  %v253_v55 = vld [vmem:[%s1536_s8 + $0x50] sm:$0xff] }
  0x29   : > { %1179 = vmatpush3.msra.mxu0 %v569_v21  ;;  %v252_v50 = vld [vmem:[%s1536_s8 + $0x48] sm:$0xff]  ;;  %v558_v53 = vld [vmem:[#allocation2] sm:$0xff]  ;;  %v412_v56 = vadd.s32 128, %v253_v55  ;;  %v254_v57 = vld [vmem:[%s1536_s8 + $0x58] sm:$0xff] }
  0x2a   : > { %1180 = vmatprep.subr.mxu0 %v584_v22  ;;  %v559_v51 = vld [vmem:[#allocation2 + $0x8] sm:$0xff]  ;;  %v411_v54 = vadd.s32 128, %v252_v50  ;;  %v413_v58 = vadd.s32 128, %v254_v57  ;;  %v255_v59 = vld [vmem:[%s1536_s8 + $0x60] sm:$0xff]  ;;  %v755_v61 = vld [vmem:[%s1873_s3 + $0x78] sm:$0xff] }
  0x2b   : > { %1181 = vmatpush3.msra.mxu0 %v568_v23  ;;  %v414_v60 = vadd.s32 128, %v255_v59  ;;  %v754_v62 = vld [vmem:[%s1873_s3 + $0x70] sm:$0xff]  ;;  %1271 = vmatpush3.msra.mxu1 %v755_v61  ;;  %v753_v63 = vld [vmem:[%s1873_s3 + $0x68] sm:$0xff]  ;;  %v751_v2 = vld [vmem:[%s1873_s3 + $0x58] sm:$0xff] }
  0x2c   : > { %1370 = vset.pattern.permute.xlu1 %v1464_v0  ;;  %422 = vperm.xlu0 %1367, %v404_v13   ;;  %v752_v0 = vld [vmem:[%s1873_s3 + $0x60] sm:$0xff]  ;;  %v750_v3 = vld [vmem:[%s1873_s3 + $0x50] sm:$0xff]  ;;  %v749_v4 = vld [vmem:[%s1873_s3 + $0x48] sm:$0xff] }
  0x2d   : > { %266 = vperm.xlu1 %1370, %v245_v9   ;;  %1182 = vmatprep.subr.mxu0 %v583_v25  ;;  %v748_v5 = vld [vmem:[%s1873_s3 + $0x40] sm:$0xff]  ;;  %v747_v6 = vld [vmem:[%s1873_s3 + $0x38] sm:$0xff]  ;;  %v746_v7 = vld [vmem:[%s1873_s3 + $0x30] sm:$0xff]  ;;  %v256_v9 = vlaneseq }
  0x2e   : > { %1183 = vmatpush3.msra.mxu0 %v567_v27  ;;  %1272 = vmatprep.subr.mxu1 %v1465_v1  ;;  %v745_v8 = vld [vmem:[%s1873_s3 + $0x28] sm:$0xff] }
  0x2f   : > { %1184 = vmatprep.subr.mxu0 %v582_v28  ;;  %1273 = vmatpush3.msra.mxu1 %v754_v62  ;;  %v1595_v10 = vand.u32 127, %v256_v9 }
  0x30   : > { %425 = vperm.xlu0 %1367, %v405_v18   ;;  %1185 = vmatpush3.msra.mxu0 %v566_v29 }
  0x31   : > { %269 = vperm.xlu1 %1370, %v246_v15   ;;  %1186 = vmatprep.subr.mxu0 %v581_v31  ;;  %v1598_v11 = vadd.s32 128, %v1595_v10 }
  0x32   : > { %1187 = vmatpush3.msra.mxu0 %v565_v33  ;;  %1274 = vmatprep.subr.mxu1 %v1465_v1 }
  0x33   : > { %1188 = vmatprep.subr.mxu0 %v580_v34  ;;  %1275 = vmatpush3.msra.mxu1 %v753_v63 }
  0x34   : > { %428 = vperm.xlu0 %1367, %v406_v24   ;;  %1189 = vmatpush3.msra.mxu0 %v564_v35 }
  0x35   : > { %272 = vperm.xlu1 %1370, %v247_v20   ;;  %1190 = vmatprep.subr.mxu0 %v579_v37 }
  0x36   : > { %1191 = vmatpush3.msra.mxu0 %v563_v39  ;;  %1276 = vmatprep.subr.mxu1 %v1465_v1 }
  0x37   : > { %1192 = vmatprep.subr.mxu0 %v578_v40  ;;  %1277 = vmatpush3.msra.mxu1 %v752_v0 }
  0x38   : > { %431 = vperm.xlu0 %1367, %v407_v30   ;;  %1193 = vmatpush3.msra.mxu0 %v562_v41 }
  0x39   : > { %275 = vperm.xlu1 %1370, %v248_v26   ;;  %1194 = vmatprep.subr.mxu0 %v577_v43 }
  0x3a   : > { %1195 = vmatpush3.msra.mxu0 %v561_v45  ;;  %1278 = vmatprep.subr.mxu1 %v1465_v1 }
  0x3b   : > { %1196 = vmatprep.subr.mxu0 %v576_v46  ;;  %1279 = vmatpush3.msra.mxu1 %v751_v2 }
  0x3c   : > { %434 = vperm.xlu0 %1367, %v408_v36   ;;  %1197 = vmatpush3.msra.mxu0 %v560_v47 }
  0x3d   : > { %278 = vperm.xlu1 %1370, %v249_v32   ;;  %1198 = vmatprep.subr.mxu0 %v575_v49 }
  0x3e   : > { %1199 = vmatpush3.msra.mxu0 %v559_v51  ;;  %1280 = vmatprep.subr.mxu1 %v1465_v1 }
  0x3f   : > { %1200 = vmatprep.subr.mxu0 %v574_v52  ;;  %1281 = vmatpush3.msra.mxu1 %v750_v3 }
  0x40   : > { %437 = vperm.xlu0 %1367, %v409_v42   ;;  %1201 = vmatpush3.msra.mxu0 %v558_v53 }
  0x41   : > { %281 = vperm.xlu1 %1370, %v250_v38   ;;  %1282 = vmatprep.subr.mxu1 %v1465_v1 }
  0x42   : > { %1283 = vmatpush3.msra.mxu1 %v749_v4 }
  0x43   : > { %1284 = vmatprep.subr.mxu1 %v1465_v1 }
  0x44   : > { %440 = vperm.xlu0 %1367, %v410_v48   ;;  %1285 = vmatpush3.msra.mxu1 %v748_v5 }
  0x45   : > { %284 = vperm.xlu1 %1370, %v251_v44   ;;  %1286 = vmatprep.subr.mxu1 %v1465_v1 }
  0x46   : > { %1287 = vmatpush3.msra.mxu1 %v747_v6 }
  0x47   : > { %1288 = vmatprep.subr.mxu1 %v1465_v1 }
  0x48   : > { %443 = vperm.xlu0 %1367, %v411_v54   ;;  %1289 = vmatpush3.msra.mxu1 %v746_v7 }
  0x49   : > { %287 = vperm.xlu1 %1370, %v252_v50   ;;  %1290 = vmatprep.subr.mxu1 %v1465_v1 }
  0x4a   : > { %1291 = vmatpush3.msra.mxu1 %v745_v8 }
  0x4b   : > { %1292 = vmatprep.subr.mxu1 %v1465_v1 }
  0x4c   : > { %446 = vperm.xlu0 %1367, %v412_v56  }
  0x4d   : > { %290 = vperm.xlu1 %1370, %v253_v55  }
  0x50   : > { %449 = vperm.xlu0 %1367, %v413_v58  }
  0x51   : > { %293 = vperm.xlu1 %1370, %v254_v57  }
  0x54   : > { %452 = vperm.xlu0 %1367, %v414_v60  }
  0x55   : > { %296 = vperm.xlu1 %1370, %v255_v59  }
  0x9e   : > { %v261_v12 = vpop.permute.xlu0 %260  ;;  %v264_v13 = vpop.permute.xlu1 %263 }
  0x9f   : > { %vm298_vm0 = vcmp.eq.s32.totalorder %v1595_v10, %v261_v12  ;;  %vm299_vm1 = vcmp.eq.s32.totalorder %v1598_v11, %v261_v12  ;;  %vm301_vm2 = vcmp.eq.s32.totalorder %v1598_v11, %v264_v13  ;;  %vm300_vm7 = vcmp.eq.s32.totalorder %v1595_v10, %v264_v13 }
  0xa0   : > { %v1114_v14 = vsel %vm298_vm0, 1.0, %v1465_v1  ;;  %v1115_v17 = vsel %vm299_vm1, 1.0, %v1465_v1  ;;  %v1117_v23 = vsel %vm301_vm2, 1.0, %v1465_v1  ;;  %v1116_v29 = vsel %vm300_vm7, 1.0, %v1465_v1 }
  0xa3   : > { %v420_v15 = vpop.permute.xlu1 %419  ;;  %v417_v16 = vpop.permute.xlu0 %416 }
  0xa4   : > { %vm457_vm3 = vcmp.eq.s32.totalorder %v1598_v11, %v420_v15  ;;  %vm454_vm4 = vcmp.eq.s32.totalorder %v1595_v10, %v417_v16  ;;  %vm455_vm5 = vcmp.eq.s32.totalorder %v1598_v11, %v417_v16  ;;  %vm456_vm6 = vcmp.eq.s32.totalorder %v1595_v10, %v420_v15 }
  0xa5   : > { %v1143_v18 = vsel %vm457_vm3, 1.0, %v1465_v1  ;;  %v1140_v19 = vsel %vm454_vm4, 1.0, %v1465_v1  ;;  %v1141_v20 = vsel %vm455_vm5, 1.0, %v1465_v1  ;;  %v1142_v25 = vsel %vm456_vm6, 1.0, %v1465_v1 }
  0xa6   : > { %v532_v21 = vadd.f32 %v1140_v19, %v1114_v14  ;;  %v533_v22 = vadd.f32 %v1141_v20, %v1115_v17  ;;  %v535_v26 = vadd.f32 %v1143_v18, %v1117_v23  ;;  %v534_v31 = vadd.f32 %v1142_v25, %v1116_v29 }
  0xa7   : > { %v423_v24 = vpop.permute.xlu0 %422 }
  0xa8   : > { %vm459_vm8 = vcmp.eq.s32.totalorder %v1598_v11, %v423_v24  ;;  %v267_v27 = vpop.permute.xlu1 %266  ;;  %661 = vmatprep.mubr.f32.mxu0 %v533_v22  ;;  %vm458_vm9 = vcmp.eq.s32.totalorder %v1595_v10, %v423_v24 }
  0xa9   : > { %v1145_v28 = vsel %vm459_vm8, 1.0, %v1465_v1  ;;  %vm302_vm10 = vcmp.eq.s32.totalorder %v1595_v10, %v267_v27  ;;  %vm303_vm11 = vcmp.eq.s32.totalorder %v1598_v11, %v267_v27  ;;  %662 = vmatmul.mubr.f32.vlgmr.msra.gmra.mxu0 %v532_v21  ;;  %v1144_v34 = vsel %vm458_vm9, 1.0, %v1465_v1 }
  0xaa   : > { %v1119_v30 = vsel %vm303_vm11, 1.0, %v1465_v1  ;;  %666 = vmatprep.mubr.f32.mxu0 %v535_v26  ;;  %v1118_v35 = vsel %vm302_vm10, 1.0, %v1465_v1 }
  0xab   : > { %v537_v32 = vadd.f32 %v1145_v28, %v1119_v30  ;;  %v426_v33 = vpop.permute.xlu0 %425  ;;  %v536_v39 = vadd.f32 %v1144_v34, %v1118_v35 }
  0xac   : > { %vm461_vm12 = vcmp.eq.s32.totalorder %v1598_v11, %v426_v33  ;;  %v270_v36 = vpop.permute.xlu1 %269  ;;  %vm460_vm13 = vcmp.eq.s32.totalorder %v1595_v10, %v426_v33 }
  0xad   : > { %v1147_v37 = vsel %vm461_vm12, 1.0, %v1465_v1  ;;  %vm304_vm14 = vcmp.eq.s32.totalorder %v1595_v10, %v270_v36  ;;  %vm305_vm15 = vcmp.eq.s32.totalorder %v1598_v11, %v270_v36  ;;  %667 = vmatmul.mubr.f32.gmra.mxu0 %v534_v31  ;;  %v1146_v42 = vsel %vm460_vm13, 1.0, %v1465_v1 }
  0xae   : > { %v1121_v38 = vsel %vm305_vm15, 1.0, %v1465_v1  ;;  %671 = vmatprep.mubr.f32.mxu0 %v537_v32  ;;  %v1120_v43 = vsel %vm304_vm14, 1.0, %v1465_v1 }
  0xaf   : > { %v539_v40 = vadd.f32 %v1147_v37, %v1121_v38  ;;  %v429_v41 = vpop.permute.xlu0 %428  ;;  %v538_v47 = vadd.f32 %v1146_v42, %v1120_v43 }
  0xb0   : > { %vm463_vm0 = vcmp.eq.s32.totalorder %v1598_v11, %v429_v41  ;;  %v273_v44 = vpop.permute.xlu1 %272  ;;  %vm462_vm1 = vcmp.eq.s32.totalorder %v1595_v10, %v429_v41 }
  0xb1   : > { %v1149_v45 = vsel %vm463_vm0, 1.0, %v1465_v1  ;;  %vm306_vm2 = vcmp.eq.s32.totalorder %v1595_v10, %v273_v44  ;;  %vm307_vm3 = vcmp.eq.s32.totalorder %v1598_v11, %v273_v44  ;;  %672 = vmatmul.mubr.f32.gmra.mxu0 %v536_v39  ;;  %v1148_v50 = vsel %vm462_vm1, 1.0, %v1465_v1 }
  0xb2   : > { %v1123_v46 = vsel %vm307_vm3, 1.0, %v1465_v1  ;;  %676 = vmatprep.mubr.f32.mxu0 %v539_v40  ;;  %v1122_v51 = vsel %vm306_vm2, 1.0, %v1465_v1 }
  0xb3   : > { %v541_v48 = vadd.f32 %v1149_v45, %v1123_v46  ;;  %v432_v49 = vpop.permute.xlu0 %431  ;;  %v540_v55 = vadd.f32 %v1148_v50, %v1122_v51 }
  0xb4   : > { %vm465_vm4 = vcmp.eq.s32.totalorder %v1598_v11, %v432_v49  ;;  %v276_v52 = vpop.permute.xlu1 %275  ;;  %vm464_vm5 = vcmp.eq.s32.totalorder %v1595_v10, %v432_v49 }
  0xb5   : > { %v1151_v53 = vsel %vm465_vm4, 1.0, %v1465_v1  ;;  %vm308_vm6 = vcmp.eq.s32.totalorder %v1595_v10, %v276_v52  ;;  %vm309_vm7 = vcmp.eq.s32.totalorder %v1598_v11, %v276_v52  ;;  %677 = vmatmul.mubr.f32.gmra.mxu0 %v538_v47  ;;  %v1150_v58 = vsel %vm464_vm5, 1.0, %v1465_v1 }
  0xb6   : > { %v1125_v54 = vsel %vm309_vm7, 1.0, %v1465_v1  ;;  %681 = vmatprep.mubr.f32.mxu0 %v541_v48  ;;  %v1124_v59 = vsel %vm308_vm6, 1.0, %v1465_v1 }
  0xb7   : > { %v543_v56 = vadd.f32 %v1151_v53, %v1125_v54  ;;  %v435_v57 = vpop.permute.xlu0 %434  ;;  %v542_v63 = vadd.f32 %v1150_v58, %v1124_v59  ;;  %v1728_v59 = vld [vmem:[%s1872_s2] ss:$0 sm:$0xff] }
  0xb8   : > { %vm467_vm8 = vcmp.eq.s32.totalorder %v1598_v11, %v435_v57  ;;  %v279_v60 = vpop.permute.xlu1 %278  ;;  %vm466_vm9 = vcmp.eq.s32.totalorder %v1595_v10, %v435_v57  ;;  %v740_v57 = vld [vmem:[%s1873_s3] sm:$0xff] }
  0xb9   : > { %v1153_v61 = vsel %vm467_vm8, 1.0, %v1465_v1  ;;  %vm310_vm10 = vcmp.eq.s32.totalorder %v1595_v10, %v279_v60  ;;  %vm311_vm11 = vcmp.eq.s32.totalorder %v1598_v11, %v279_v60  ;;  %682 = vmatmul.mubr.f32.gmra.mxu0 %v540_v55  ;;  %v1152_v3 = vsel %vm466_vm9, 1.0, %v1465_v1  ;;  %v742_v55 = vld [vmem:[%s1873_s3 + $0x10] sm:$0xff] }
  0xba   : > { %v1127_v62 = vsel %vm311_vm11, 1.0, %v1465_v1  ;;  %686 = vmatprep.mubr.f32.mxu0 %v543_v56  ;;  %v1126_v4 = vsel %vm310_vm10, 1.0, %v1465_v1  ;;  %v741_v56 = vld [vmem:[%s1873_s3 + $0x8] sm:$0xff] }
  0xbb   : > { %v545_v0 = vadd.f32 %v1153_v61, %v1127_v62  ;;  %v438_v2 = vpop.permute.xlu0 %437  ;;  %v544_v8 = vadd.f32 %v1152_v3, %v1126_v4 }
  0xbc   : > { %vm469_vm12 = vcmp.eq.s32.totalorder %v1598_v11, %v438_v2  ;;  %v282_v5 = vpop.permute.xlu1 %281  ;;  %vm468_vm13 = vcmp.eq.s32.totalorder %v1595_v10, %v438_v2 }
  0xbd   : > { %v1155_v6 = vsel %vm469_vm12, 1.0, %v1465_v1  ;;  %vm312_vm14 = vcmp.eq.s32.totalorder %v1595_v10, %v282_v5  ;;  %vm313_vm15 = vcmp.eq.s32.totalorder %v1598_v11, %v282_v5  ;;  %687 = vmatmul.mubr.f32.gmra.mxu0 %v542_v63  ;;  %v1154_v13 = vsel %vm468_vm13, 1.0, %v1465_v1 }
  0xbe   : > { %v1129_v7 = vsel %vm313_vm15, 1.0, %v1465_v1  ;;  %691 = vmatprep.mubr.f32.mxu0 %v545_v0  ;;  %v1128_v14 = vsel %vm312_vm14, 1.0, %v1465_v1 }
  0xbf   : > { %v547_v9 = vadd.f32 %v1155_v6, %v1129_v7  ;;  %v441_v12 = vpop.permute.xlu0 %440  ;;  %v546_v18 = vadd.f32 %v1154_v13, %v1128_v14 }
  0xc0   : > { %vm471_vm0 = vcmp.eq.s32.totalorder %v1598_v11, %v441_v12  ;;  %v285_v15 = vpop.permute.xlu1 %284  ;;  %vm470_vm1 = vcmp.eq.s32.totalorder %v1595_v10, %v441_v12 }
  0xc1   : > { %v1157_v16 = vsel %vm471_vm0, 1.0, %v1465_v1  ;;  %vm314_vm2 = vcmp.eq.s32.totalorder %v1595_v10, %v285_v15  ;;  %vm315_vm3 = vcmp.eq.s32.totalorder %v1598_v11, %v285_v15  ;;  %692 = vmatmul.mubr.f32.gmra.mxu0 %v544_v8  ;;  %v1156_v21 = vsel %vm470_vm1, 1.0, %v1465_v1 }
  0xc2   : > { %v1131_v17 = vsel %vm315_vm3, 1.0, %v1465_v1  ;;  %696 = vmatprep.mubr.f32.mxu0 %v547_v9  ;;  %v1130_v22 = vsel %vm314_vm2, 1.0, %v1465_v1 }
  0xc3   : > { %v549_v19 = vadd.f32 %v1157_v16, %v1131_v17  ;;  %v444_v20 = vpop.permute.xlu0 %443  ;;  %v548_v26 = vadd.f32 %v1156_v21, %v1130_v22 }
  0xc4   : > { %vm473_vm4 = vcmp.eq.s32.totalorder %v1598_v11, %v444_v20  ;;  %v288_v23 = vpop.permute.xlu1 %287  ;;  %vm472_vm5 = vcmp.eq.s32.totalorder %v1595_v10, %v444_v20 }
  0xc5   : > { %v1159_v24 = vsel %vm473_vm4, 1.0, %v1465_v1  ;;  %vm316_vm6 = vcmp.eq.s32.totalorder %v1595_v10, %v288_v23  ;;  %vm317_vm7 = vcmp.eq.s32.totalorder %v1598_v11, %v288_v23  ;;  %697 = vmatmul.mubr.f32.gmra.mxu0 %v546_v18  ;;  %v1158_v29 = vsel %vm472_vm5, 1.0, %v1465_v1 }
  0xc6   : > { %v1133_v25 = vsel %vm317_vm7, 1.0, %v1465_v1  ;;  %701 = vmatprep.mubr.f32.mxu0 %v549_v19  ;;  %v1132_v30 = vsel %vm316_vm6, 1.0, %v1465_v1  ;;  %vm1467_vm4 = vmmov 0   ;;  %vm1023_vm5 = vcmask 261120  }
  0xc7   : > { %v551_v27 = vadd.f32 %v1159_v24, %v1133_v25  ;;  %v447_v28 = vpop.permute.xlu0 %446  ;;  %v550_v34 = vadd.f32 %v1158_v29, %v1132_v30  ;;  %1302 = vmatprep.mubr.msk.f32.mxu1 %vm1467_vm4, %v1465_v1 }
  0xc8   : > { %vm475_vm8 = vcmp.eq.s32.totalorder %v1598_v11, %v447_v28  ;;  %v291_v31 = vpop.permute.xlu1 %290  ;;  %vm474_vm9 = vcmp.eq.s32.totalorder %v1595_v10, %v447_v28 }
  0xc9   : > { %v1161_v32 = vsel %vm475_vm8, 1.0, %v1465_v1  ;;  %vm318_vm10 = vcmp.eq.s32.totalorder %v1595_v10, %v291_v31  ;;  %vm319_vm11 = vcmp.eq.s32.totalorder %v1598_v11, %v291_v31  ;;  %702 = vmatmul.mubr.f32.gmra.mxu0 %v548_v26  ;;  %v1160_v37 = vsel %vm474_vm9, 1.0, %v1465_v1 }
  0xca   : > { %v1135_v33 = vsel %vm319_vm11, 1.0, %v1465_v1  ;;  %706 = vmatprep.mubr.f32.mxu0 %v551_v27  ;;  %v1134_v38 = vsel %vm318_vm10, 1.0, %v1465_v1 }
  0xcb   : > { %v553_v35 = vadd.f32 %v1161_v32, %v1135_v33  ;;  %v450_v36 = vpop.permute.xlu0 %449  ;;  %v552_v42 = vadd.f32 %v1160_v37, %v1134_v38 }
  0xcc   : > { %vm477_vm12 = vcmp.eq.s32.totalorder %v1598_v11, %v450_v36  ;;  %v294_v39 = vpop.permute.xlu1 %293  ;;  %vm476_vm13 = vcmp.eq.s32.totalorder %v1595_v10, %v450_v36 }
  0xcd   : > { %v1163_v40 = vsel %vm477_vm12, 1.0, %v1465_v1  ;;  %vm320_vm14 = vcmp.eq.s32.totalorder %v1595_v10, %v294_v39  ;;  %vm321_vm15 = vcmp.eq.s32.totalorder %v1598_v11, %v294_v39  ;;  %707 = vmatmul.mubr.f32.gmra.mxu0 %v550_v34  ;;  %v1162_v45 = vsel %vm476_vm13, 1.0, %v1465_v1 }
  0xce   : > { %v1137_v41 = vsel %vm321_vm15, 1.0, %v1465_v1  ;;  %711 = vmatprep.mubr.f32.mxu0 %v553_v35  ;;  %v1136_v46 = vsel %vm320_vm14, 1.0, %v1465_v1 }
  0xcf   : > { %v555_v43 = vadd.f32 %v1163_v40, %v1137_v41  ;;  %v453_v44 = vpop.permute.xlu0 %452  ;;  %v554_v50 = vadd.f32 %v1162_v45, %v1136_v46 }
  0xd0   : > { %vm479_vm0 = vcmp.eq.s32.totalorder %v1598_v11, %v453_v44  ;;  %v297_v47 = vpop.permute.xlu1 %296  ;;  %vm478_vm1 = vcmp.eq.s32.totalorder %v1595_v10, %v453_v44 }
  0xd1   : > { %v1165_v48 = vsel %vm479_vm0, 1.0, %v1465_v1  ;;  %vm322_vm2 = vcmp.eq.s32.totalorder %v1595_v10, %v297_v47  ;;  %vm323_vm3 = vcmp.eq.s32.totalorder %v1598_v11, %v297_v47  ;;  %712 = vmatmul.mubr.f32.gmra.mxu0 %v552_v42  ;;  %v1164_v52 = vsel %vm478_vm1, 1.0, %v1465_v1  ;;  %v744_v10 = vld [vmem:[%s1873_s3 + $0x20] sm:$0xff]  ;;  %v743_v11 = vld [vmem:[%s1873_s3 + $0x18] sm:$0xff] }
  0xd2   : > { %v1139_v49 = vsel %vm323_vm3, 1.0, %v1465_v1  ;;  %716 = vmatprep.mubr.f32.mxu0 %v555_v43  ;;  %v1138_v53 = vsel %vm322_vm2, 1.0, %v1465_v1  ;;  %1293 = vmatpush3.msra.mxu1 %v744_v10 }
  0xd3   : > { %v557_v51 = vadd.f32 %v1165_v48, %v1139_v49  ;;  %v556_v54 = vadd.f32 %v1164_v52, %v1138_v53  ;;  %1294 = vmatprep.subr.mxu1 %v1465_v1 }
  0xd4   : > { %1295 = vmatpush3.msra.mxu1 %v743_v11 }
  0xd5   : > { %717 = vmatmul.mubr.f32.gmra.mxu0 %v554_v50  ;;  %1296 = vmatprep.subr.mxu1 %v1465_v1 }
  0xd6   : > { %721 = vmatprep.mubr.f32.mxu0 %v557_v51  ;;  %1297 = vmatpush3.msra.mxu1 %v742_v55 }
  0xd7   : > { %1298 = vmatprep.subr.mxu1 %v1465_v1 }
  0xd8   : > { %1299 = vmatpush3.msra.mxu1 %v741_v56 }
  0xd9   : > { %722 = vmatmul.mubr.f32.gmra.mxu0 %v556_v54  ;;  %1300 = vmatprep.subr.mxu1 %v1465_v1 }
  0xda   : > { %1301 = vmatpush3.msra.mxu1 %v740_v57 }
 0x169   : > { %v1202_v58 = vpop.f32.mrf.mxu0 }
 0x16b   : > { %v1203_v60 = vpop.f32.mrf.mxu0 }
 0x16c   : > { %v1204_v61 = vadd.f32 %v1203_v60, %v1202_v58 }
 0x16d   : > { %v1205_v62 = vpop.f32.mrf.mxu0 }
 0x16e   : > { %v664_v63 = vadd.f32 %v1204_v61, %v1728_v59 }
 0x16f   : > { %v1206_v0 = vpop.f32.mrf.mxu0 }
 0x170   : > { %v727_v2 = vmax.f32 %v664_v63, 0.0  ;;  %v1207_v3 = vadd.f32 %v1206_v0, %v1205_v62  ;;  %v1167_v62 = vld [vmem:[%s1874_s4] ss:$0 sm:$0xff] }
 0x171   : > { %v1208_v4 = vpop.f32.mrf.mxu0 }
 0x172   : > { %v669_v5 = vadd.f32 %v1207_v3, %v1728_v59  ;;  %1303 = vmatmul.mubr.f32.vlgmr.msra.gmra.mxu1 %v727_v2 }
 0x173   : > { %v1209_v6 = vpop.f32.mrf.mxu0  ;;  %1305 = vmatprep.mubr.msk.f32.mxu1 %vm1467_vm4, %v1465_v1 }
 0x174   : > { %v728_v7 = vmax.f32 %v669_v5, 0.0  ;;  %v1210_v8 = vadd.f32 %v1209_v6, %v1208_v4 }
 0x175   : > { %v1211_v9 = vpop.f32.mrf.mxu0 }
 0x176   : > { %v674_v12 = vadd.f32 %v1210_v8, %v1728_v59  ;;  %1306 = vmatmul.mubr.f32.gmra.mxu1 %v728_v7 }
 0x177   : > { %v1212_v13 = vpop.f32.mrf.mxu0  ;;  %1308 = vmatprep.mubr.msk.f32.mxu1 %vm1467_vm4, %v1465_v1 }
 0x178   : > { %v729_v14 = vmax.f32 %v674_v12, 0.0  ;;  %v1213_v15 = vadd.f32 %v1212_v13, %v1211_v9 }
 0x179   : > { %v1214_v16 = vpop.f32.mrf.mxu0 }
 0x17a   : > { %v679_v17 = vadd.f32 %v1213_v15, %v1728_v59  ;;  %1309 = vmatmul.mubr.f32.gmra.mxu1 %v729_v14 }
 0x17b   : > { %v1215_v18 = vpop.f32.mrf.mxu0  ;;  %1311 = vmatprep.mubr.msk.f32.mxu1 %vm1467_vm4, %v1465_v1 }
 0x17c   : > { %v730_v19 = vmax.f32 %v679_v17, 0.0  ;;  %v1216_v20 = vadd.f32 %v1215_v18, %v1214_v16 }
 0x17d   : > { %v1217_v21 = vpop.f32.mrf.mxu0 }
 0x17e   : > { %v684_v22 = vadd.f32 %v1216_v20, %v1728_v59  ;;  %1312 = vmatmul.mubr.f32.gmra.mxu1 %v730_v19 }
 0x17f   : > { %v1218_v23 = vpop.f32.mrf.mxu0  ;;  %1314 = vmatprep.mubr.msk.f32.mxu1 %vm1467_vm4, %v1465_v1 }
 0x180   : > { %v731_v24 = vmax.f32 %v684_v22, 0.0  ;;  %v1219_v25 = vadd.f32 %v1218_v23, %v1217_v21 }
 0x181   : > { %v1220_v26 = vpop.f32.mrf.mxu0 }
 0x182   : > { %v689_v27 = vadd.f32 %v1219_v25, %v1728_v59  ;;  %1315 = vmatmul.mubr.f32.gmra.mxu1 %v731_v24 }
 0x183   : > { %v1221_v28 = vpop.f32.mrf.mxu0  ;;  %1317 = vmatprep.mubr.msk.f32.mxu1 %vm1467_vm4, %v1465_v1 }
 0x184   : > { %v732_v29 = vmax.f32 %v689_v27, 0.0  ;;  %v1222_v30 = vadd.f32 %v1221_v28, %v1220_v26 }
 0x185   : > { %v1223_v31 = vpop.f32.mrf.mxu0 }
 0x186   : > { %v694_v32 = vadd.f32 %v1222_v30, %v1728_v59  ;;  %1318 = vmatmul.mubr.f32.gmra.mxu1 %v732_v29 }
 0x187   : > { %v1224_v33 = vpop.f32.mrf.mxu0  ;;  %1320 = vmatprep.mubr.msk.f32.mxu1 %vm1467_vm4, %v1465_v1 }
 0x188   : > { %v733_v34 = vmax.f32 %v694_v32, 0.0  ;;  %v1225_v35 = vadd.f32 %v1224_v33, %v1223_v31 }
 0x189   : > { %v1226_v36 = vpop.f32.mrf.mxu0 }
 0x18a   : > { %v699_v37 = vadd.f32 %v1225_v35, %v1728_v59  ;;  %1321 = vmatmul.mubr.f32.gmra.mxu1 %v733_v34 }
 0x18b   : > { %v1227_v38 = vpop.f32.mrf.mxu0  ;;  %1323 = vmatprep.mubr.msk.f32.mxu1 %vm1467_vm4, %v1465_v1 }
 0x18c   : > { %v734_v39 = vmax.f32 %v699_v37, 0.0  ;;  %v1228_v40 = vadd.f32 %v1227_v38, %v1226_v36 }
 0x18d   : > { %v1229_v41 = vpop.f32.mrf.mxu0 }
 0x18e   : > { %v704_v42 = vadd.f32 %v1228_v40, %v1728_v59  ;;  %1324 = vmatmul.mubr.f32.gmra.mxu1 %v734_v39 }
 0x18f   : > { %v1230_v43 = vpop.f32.mrf.mxu0  ;;  %1326 = vmatprep.mubr.msk.f32.mxu1 %vm1467_vm4, %v1465_v1 }
 0x190   : > { %v735_v44 = vmax.f32 %v704_v42, 0.0  ;;  %v1231_v45 = vadd.f32 %v1230_v43, %v1229_v41 }
 0x191   : > { %v1232_v46 = vpop.f32.mrf.mxu0 }
 0x192   : > { %v709_v47 = vadd.f32 %v1231_v45, %v1728_v59  ;;  %1327 = vmatmul.mubr.f32.gmra.mxu1 %v735_v44 }
 0x193   : > { %v1233_v48 = vpop.f32.mrf.mxu0  ;;  %1329 = vmatprep.mubr.msk.f32.mxu1 %vm1467_vm4, %v1465_v1 }
 0x194   : > { %v736_v49 = vmax.f32 %v709_v47, 0.0  ;;  %v1234_v50 = vadd.f32 %v1233_v48, %v1232_v46 }
 0x195   : > { %v1235_v51 = vpop.f32.mrf.mxu0 }
 0x196   : > { %v714_v52 = vadd.f32 %v1234_v50, %v1728_v59  ;;  %1330 = vmatmul.mubr.f32.gmra.mxu1 %v736_v49 }
 0x197   : > { %v1236_v53 = vpop.f32.mrf.mxu0  ;;  %1332 = vmatprep.mubr.msk.f32.mxu1 %vm1467_vm4, %v1465_v1 }
 0x198   : > { %v737_v54 = vmax.f32 %v714_v52, 0.0  ;;  %v1237_v10 = vadd.f32 %v1236_v53, %v1235_v51 }
 0x199   : > { %v1238_v11 = vpop.f32.mrf.mxu0 }
 0x19a   : > { %v719_v55 = vadd.f32 %v1237_v10, %v1728_v59  ;;  %1333 = vmatmul.mubr.f32.gmra.mxu1 %v737_v54 }
 0x19b   : > { %v1239_v56 = vpop.f32.mrf.mxu0  ;;  %1335 = vmatprep.mubr.msk.f32.mxu1 %vm1467_vm4, %v1465_v1 }
 0x19c   : > { %v738_v57 = vmax.f32 %v719_v55, 0.0  ;;  %v1240_v58 = vadd.f32 %v1239_v56, %v1238_v11 }
 0x19e   : > { %v724_v60 = vadd.f32 %v1240_v58, %v1728_v59  ;;  %1336 = vmatmul.mubr.f32.gmra.mxu1 %v738_v57 }
 0x19f   : > { %1338 = vmatprep.mubr.msk.f32.mxu1 %vm1467_vm4, %v1465_v1 }
 0x1a0   : > { %v739_v61 = vmax.f32 %v724_v60, 0.0 }
 0x1a2   : > { %1339 = vmatmul.mubr.f32.gmra.mxu1 %v739_v61 }
 0x232   : > { %v829_v63 = vpop.f32.mrf.mxu1 }
 0x233   : > { %v830_v0 = vadd.f32 %v1167_v62, %v829_v63 }
 0x234   : > { %v1304_v2 = vpop.f32.mrf.mxu1 }
 0x235   : > { %893 = vmax.xlane.f32.xlu1 %v830_v0 }
 0x236   : > { %v834_v3 = vpop.f32.mrf.mxu1 }
 0x237   : > { %v835_v4 = vadd.f32 %v1167_v62, %v834_v3 }
 0x238   : > { %v1307_v5 = vpop.f32.mrf.mxu1 }
 0x239   : > { %895 = vmax.xlane.f32.xlu0 %v835_v4 }
 0x23a   : > { %v839_v6 = vpop.f32.mrf.mxu1 }
 0x23b   : > { %v840_v59 = vadd.f32 %v1167_v62, %v839_v6 }
 0x23c   : > { %v1310_v7 = vpop.f32.mrf.mxu1 }
 0x23d   : > { %897 = vmax.xlane.f32.xlu0 %v840_v59 }
 0x23e   : > { %v844_v8 = vpop.f32.mrf.mxu1 }
 0x23f   : > { %v845_v1 = vadd.f32 %v1167_v62, %v844_v8 }
 0x240   : > { %v1313_v9 = vpop.f32.mrf.mxu1 }
 0x241   : > { %899 = vmax.xlane.f32.xlu1 %v845_v1 }
 0x242   : > { %v849_v12 = vpop.f32.mrf.mxu1 }
 0x243   : > { %v850_v13 = vadd.f32 %v1167_v62, %v849_v12 }
 0x244   : > { %v1316_v14 = vpop.f32.mrf.mxu1 }
 0x245   : > { %901 = vmax.xlane.f32.xlu0 %v850_v13 }
 0x246   : > { %v854_v15 = vpop.f32.mrf.mxu1 }
 0x247   : > { %v855_v16 = vadd.f32 %v1167_v62, %v854_v15 }
 0x248   : > { %v1319_v17 = vpop.f32.mrf.mxu1 }
 0x249   : > { %903 = vmax.xlane.f32.xlu1 %v855_v16 }
 0x24a   : > { %v859_v18 = vpop.f32.mrf.mxu1 }
 0x24b   : > { %v860_v19 = vadd.f32 %v1167_v62, %v859_v18 }
 0x24c   : > { %v1322_v20 = vpop.f32.mrf.mxu1 }
 0x24d   : > { %905 = vmax.xlane.f32.xlu0 %v860_v19 }
 0x24e   : > { %v864_v21 = vpop.f32.mrf.mxu1 }
 0x24f   : > { %v865_v22 = vadd.f32 %v1167_v62, %v864_v21 }
 0x250   : > { %v1325_v23 = vpop.f32.mrf.mxu1 }
 0x251   : > { %907 = vmax.xlane.f32.xlu1 %v865_v22 }
 0x252   : > { %v869_v24 = vpop.f32.mrf.mxu1 }
 0x253   : > { %v870_v25 = vadd.f32 %v1167_v62, %v869_v24 }
 0x254   : > { %v1328_v26 = vpop.f32.mrf.mxu1 }
 0x255   : > { %909 = vmax.xlane.f32.xlu0 %v870_v25 }
 0x256   : > { %v874_v27 = vpop.f32.mrf.mxu1 }
 0x257   : > { %v875_v28 = vadd.f32 %v1167_v62, %v874_v27 }
 0x258   : > { %v1331_v29 = vpop.f32.mrf.mxu1 }
 0x259   : > { %911 = vmax.xlane.f32.xlu1 %v875_v28 }
 0x25a   : > { %v879_v30 = vpop.f32.mrf.mxu1 }
 0x25b   : > { %v1770_v31 = vadd.f32 %v1167_v62, %v879_v30 }
 0x25c   : > { %v1334_v32 = vpop.f32.mrf.mxu1 }
 0x25d   : > { %913 = vmax.xlane.f32.xlu0 %v1770_v31 }
 0x25e   : > { %v884_v33 = vpop.f32.mrf.mxu1 }
 0x25f   : > { %v1773_v34 = vadd.f32 %v1167_v62, %v884_v33 }
 0x260   : > { %v1337_v35 = vpop.f32.mrf.mxu1 }
 0x261   : > { %915 = vmax.xlane.f32.xlu1 %v1773_v34 }
 0x262   : > { %v889_v36 = vpop.f32.mrf.mxu1 }
 0x263   : > { %v1776_v37 = vadd.f32 %v1167_v62, %v889_v36 }
 0x264   : > { %v1340_v38 = vpop.f32.mrf.mxu1 }
 0x265   : > { %917 = vmax.xlane.f32.xlu0 %v1776_v37 }
 0x2be   : > { %v894_v39 = vpop.xlane.xlu1 %893 }
 0x2bf   : > { %v1779_v40 = vsub.f32 %v830_v0, %v894_v39 }
 0x2c1   : > { %v932_v41 = vmul.f32 1.442695, %v1779_v40 }
 0x2c2   : > { %v896_v42 = vpop.xlane.xlu0 %895 }
 0x2c3   : > { %1371 = vpow2.f32 %v932_v41  ;;  %v1782_v43 = vsub.f32 %v835_v4, %v896_v42 }
 0x2c5   : > { %v934_v44 = vmul.f32 1.442695, %v1782_v43 }
 0x2c6   : > { %v898_v45 = vpop.xlane.xlu0 %897 }
 0x2c7   : > { %1373 = vpow2.f32 %v934_v44  ;;  %v1785_v46 = vsub.f32 %v840_v59, %v898_v45 }
 0x2c9   : > { %v936_v47 = vmul.f32 1.442695, %v1785_v46 }
 0x2ca   : > { %v900_v48 = vpop.xlane.xlu1 %899 }
 0x2cb   : > { %1375 = vpow2.f32 %v936_v47  ;;  %v1788_v49 = vsub.f32 %v845_v1, %v900_v48 }
 0x2cd   : > { %v938_v50 = vmul.f32 1.442695, %v1788_v49 }
 0x2ce   : > { %v902_v51 = vpop.xlane.xlu0 %901 }
 0x2cf   : > { %1377 = vpow2.f32 %v938_v50  ;;  %v1791_v52 = vsub.f32 %v850_v13, %v902_v51 }
 0x2d0   : > { %v1372_v53 = vpop.eup %1371 }
 0x2d1   : > { %v940_v54 = vmul.f32 1.442695, %v1791_v52  ;;  %958 = vadd.xlane.f32.xlu1 %v1372_v53 }
 0x2d2   : > { %v904_v10 = vpop.xlane.xlu1 %903 }
 0x2d3   : > { %1379 = vpow2.f32 %v940_v54  ;;  %v1794_v11 = vsub.f32 %v855_v16, %v904_v10 }
 0x2d4   : > { %v1374_v55 = vpop.eup %1373 }
 0x2d5   : > { %v942_v56 = vmul.f32 1.442695, %v1794_v11  ;;  %960 = vadd.xlane.f32.xlu0 %v1374_v55 }
 0x2d6   : > { %v906_v57 = vpop.xlane.xlu0 %905 }
 0x2d7   : > { %1381 = vpow2.f32 %v942_v56  ;;  %v1797_v58 = vsub.f32 %v860_v19, %v906_v57 }
 0x2d8   : > { %v1376_v60 = vpop.eup %1375 }
 0x2d9   : > { %v944_v61 = vmul.f32 1.442695, %v1797_v58  ;;  %962 = vadd.xlane.f32.xlu1 %v1376_v60 }
 0x2da   : > { %v908_v62 = vpop.xlane.xlu1 %907 }
 0x2db   : > { %1383 = vpow2.f32 %v944_v61  ;;  %v1800_v63 = vsub.f32 %v865_v22, %v908_v62 }
 0x2dc   : > { %v1378_v0 = vpop.eup %1377 }
 0x2dd   : > { %v946_v2 = vmul.f32 1.442695, %v1800_v63  ;;  %964 = vadd.xlane.f32.xlu0 %v1378_v0 }
 0x2de   : > { %v910_v3 = vpop.xlane.xlu0 %909 }
 0x2df   : > { %1385 = vpow2.f32 %v946_v2  ;;  %v1803_v4 = vsub.f32 %v870_v25, %v910_v3 }
 0x2e0   : > { %v1380_v5 = vpop.eup %1379 }
 0x2e1   : > { %v948_v6 = vmul.f32 1.442695, %v1803_v4  ;;  %966 = vadd.xlane.f32.xlu1 %v1380_v5 }
 0x2e2   : > { %v912_v59 = vpop.xlane.xlu1 %911 }
 0x2e3   : > { %1387 = vpow2.f32 %v948_v6  ;;  %v1806_v7 = vsub.f32 %v875_v28, %v912_v59 }
 0x2e4   : > { %v1382_v8 = vpop.eup %1381 }
 0x2e5   : > { %v950_v1 = vmul.f32 1.442695, %v1806_v7  ;;  %968 = vadd.xlane.f32.xlu0 %v1382_v8 }
 0x2e6   : > { %v914_v9 = vpop.xlane.xlu0 %913 }
 0x2e7   : > { %1389 = vpow2.f32 %v950_v1  ;;  %v1810_v12 = vsub.f32 %v1770_v31, %v914_v9 }
 0x2e8   : > { %v1384_v13 = vpop.eup %1383 }
 0x2e9   : > { %v952_v14 = vmul.f32 1.442695, %v1810_v12  ;;  %970 = vadd.xlane.f32.xlu1 %v1384_v13 }
 0x2ea   : > { %v916_v15 = vpop.xlane.xlu1 %915 }
 0x2eb   : > { %1391 = vpow2.f32 %v952_v14  ;;  %v1814_v16 = vsub.f32 %v1773_v34, %v916_v15 }
 0x2ec   : > { %v1386_v17 = vpop.eup %1385 }
 0x2ed   : > { %v954_v18 = vmul.f32 1.442695, %v1814_v16  ;;  %972 = vadd.xlane.f32.xlu0 %v1386_v17 }
 0x2ee   : > { %v918_v19 = vpop.xlane.xlu0 %917 }
 0x2ef   : > { %1393 = vpow2.f32 %v954_v18  ;;  %v1818_v20 = vsub.f32 %v1776_v37, %v918_v19 }
 0x2f0   : > { %v1388_v21 = vpop.eup %1387 }
 0x2f1   : > { %v956_v22 = vmul.f32 1.442695, %v1818_v20  ;;  %974 = vadd.xlane.f32.xlu1 %v1388_v21 }
 0x2f3   : > { %1395 = vpow2.f32 %v956_v22 }
 0x2f4   : > { %v1390_v23 = vpop.eup %1389 }
 0x2f5   : > { %976 = vadd.xlane.f32.xlu0 %v1390_v23 }
 0x2f8   : > { %v1392_v24 = vpop.eup %1391 }
 0x2f9   : > { %978 = vadd.xlane.f32.xlu1 %v1392_v24 }
 0x2fc   : > { %v1394_v25 = vpop.eup %1393 }
 0x2fd   : > { %980 = vadd.xlane.f32.xlu0 %v1394_v25 }
 0x300   : > { %v1396_v26 = vpop.eup %1395 }
 0x301   : > { %982 = vadd.xlane.f32.xlu1 %v1396_v26 }
 0x35a   : > { %v959_v27 = vpop.xlane.xlu1 %958 }
 0x35b   : > { %1397 = vlog2.f32 %v959_v27 }
 0x35e   : > { %v961_v28 = vpop.xlane.xlu0 %960 }
 0x35f   : > { %1399 = vlog2.f32 %v961_v28 }
 0x362   : > { %v963_v29 = vpop.xlane.xlu1 %962 }
 0x363   : > { %1401 = vlog2.f32 %v963_v29 }
 0x366   : > { %v965_v30 = vpop.xlane.xlu0 %964 }
 0x367   : > { %1403 = vlog2.f32 %v965_v30 }
 0x368   : > { %v1398_v31 = vpop.eup %1397 }
 0x369   : > { %v985_v32 = vmul.f32 0.6931472, %v1398_v31 }
 0x36a   : > { %v967_v33 = vpop.xlane.xlu1 %966 }
 0x36b   : > { %v1010_v34 = vsub.f32 %v1779_v40, %v985_v32  ;;  %1405 = vlog2.f32 %v967_v33 }
 0x36c   : > { %v1400_v35 = vpop.eup %1399 }
 0x36d   : > { %1024 = vst.msk [vmem:[%s1826_s26] sm:$0xff] %vm1023_vm5, %v1010_v34  ;;  %v987_v36 = vmul.f32 0.6931472, %v1400_v35 }
 0x36e   : > { %v969_v37 = vpop.xlane.xlu0 %968 }
 0x36f   : > { %v1011_v38 = vsub.f32 %v1782_v43, %v987_v36  ;;  %1407 = vlog2.f32 %v969_v37 }
 0x370   : > { %v1402_v39 = vpop.eup %1401 }
 0x371   : > { %1025 = vst.msk [vmem:[%s1826_s26 + $0x8] sm:$0xff] %vm1023_vm5, %v1011_v38  ;;  %v989_v41 = vmul.f32 0.6931472, %v1402_v39 }
 0x372   : > { %v971_v42 = vpop.xlane.xlu1 %970 }
 0x373   : > { %v1012_v44 = vsub.f32 %v1785_v46, %v989_v41  ;;  %1409 = vlog2.f32 %v971_v42 }
 0x374   : > { %v1404_v40 = vpop.eup %1403 }
 0x375   : > { %1026 = vst.msk [vmem:[%s1826_s26 + $0x10] sm:$0xff] %vm1023_vm5, %v1012_v44  ;;  %v991_v45 = vmul.f32 0.6931472, %v1404_v40 }
 0x376   : > { %v973_v47 = vpop.xlane.xlu0 %972 }
 0x377   : > { %v1013_v48 = vsub.f32 %v1788_v49, %v991_v45  ;;  %1411 = vlog2.f32 %v973_v47 }
 0x378   : > { %v1406_v43 = vpop.eup %1405 }
 0x379   : > { %1027 = vst.msk [vmem:[%s1826_s26 + $0x18] sm:$0xff] %vm1023_vm5, %v1013_v48  ;;  %v993_v50 = vmul.f32 0.6931472, %v1406_v43 }
 0x37a   : > { %v975_v51 = vpop.xlane.xlu1 %974 }
 0x37b   : > { %v1014_v53 = vsub.f32 %v1791_v52, %v993_v50  ;;  %1413 = vlog2.f32 %v975_v51 }
 0x37c   : > { %v1408_v46 = vpop.eup %1407 }
 0x37d   : > { %1028 = vst.msk [vmem:[%s1826_s26 + $0x20] sm:$0xff] %vm1023_vm5, %v1014_v53  ;;  %v995_v54 = vmul.f32 0.6931472, %v1408_v46 }
 0x37e   : > { %v977_v10 = vpop.xlane.xlu0 %976 }
 0x37f   : > { %v1015_v55 = vsub.f32 %v1794_v11, %v995_v54  ;;  %1415 = vlog2.f32 %v977_v10 }
 0x380   : > { %v1410_v49 = vpop.eup %1409 }
 0x381   : > { %1029 = vst.msk [vmem:[%s1826_s26 + $0x28] sm:$0xff] %vm1023_vm5, %v1015_v55  ;;  %v997_v56 = vmul.f32 0.6931472, %v1410_v49 }
 0x382   : > { %v979_v57 = vpop.xlane.xlu1 %978 }
 0x383   : > { %v1016_v60 = vsub.f32 %v1797_v58, %v997_v56  ;;  %1417 = vlog2.f32 %v979_v57 }
 0x384   : > { %v1412_v52 = vpop.eup %1411 }
 0x385   : > { %1030 = vst.msk [vmem:[%s1826_s26 + $0x30] sm:$0xff] %vm1023_vm5, %v1016_v60  ;;  %v999_v61 = vmul.f32 0.6931472, %v1412_v52 }
 0x386   : > { %v981_v62 = vpop.xlane.xlu0 %980 }
 0x387   : > { %v1017_v0 = vsub.f32 %v1800_v63, %v999_v61  ;;  %1419 = vlog2.f32 %v981_v62 }
 0x388   : > { %v1414_v11 = vpop.eup %1413 }
 0x389   : > { %1031 = vst.msk [vmem:[%s1826_s26 + $0x38] sm:$0xff] %vm1023_vm5, %v1017_v0  ;;  %v1001_v2 = vmul.f32 0.6931472, %v1414_v11 }
 0x38a   : > { %v983_v3 = vpop.xlane.xlu1 %982 }
 0x38b   : > { %v1018_v5 = vsub.f32 %v1803_v4, %v1001_v2  ;;  %1421 = vlog2.f32 %v983_v3 }
 0x38c   : > { %v1416_v58 = vpop.eup %1415 }
 0x38d   : > { %1032 = vst.msk [vmem:[%s1826_s26 + $0x40] sm:$0xff] %vm1023_vm5, %v1018_v5  ;;  %v1003_v6 = vmul.f32 0.6931472, %v1416_v58 }
 0x38f   : > { %v1019_v59 = vsub.f32 %v1806_v7, %v1003_v6 }
 0x390   : > { %v1418_v8 = vpop.eup %1417 }
 0x391   : > { %1033 = vst.msk [vmem:[%s1826_s26 + $0x48] sm:$0xff] %vm1023_vm5, %v1019_v59  ;;  %v1005_v63 = vmul.f32 0.6931472, %v1418_v8 }
 0x393   : > { %v1020_v1 = vsub.f32 %v1810_v12, %v1005_v63 }
 0x394   : > { %v1420_v9 = vpop.eup %1419 }
 0x395   : > { %1034 = vst.msk [vmem:[%s1826_s26 + $0x50] sm:$0xff] %vm1023_vm5, %v1020_v1  ;;  %v1007_v13 = vmul.f32 0.6931472, %v1420_v9 }
 0x397   : > { %v1021_v4 = vsub.f32 %v1814_v16, %v1007_v13 }
 0x398   : > { %v1422_v14 = vpop.eup %1421 }
 0x399   : > { %1035 = vst.msk [vmem:[%s1826_s26 + $0x58] sm:$0xff] %vm1023_vm5, %v1021_v4  ;;  %v1009_v15 = vmul.f32 0.6931472, %v1422_v14 }
 0x39b   : > { %v1022_v17 = vsub.f32 %v1818_v20, %v1009_v15 }
 0x39d   : > { %1036 = vst.msk [vmem:[%s1826_s26 + $0x60] sm:$0xff] %vm1023_vm5, %v1022_v17 }
 0x39e PF: > { %s16_s18 = sadd.s32 1, %s1459_s18  }
 0x39f   : > { %p13_p1 = scmp.ge.s32.totalorder %s16_s18, 4  }
 0x3a1   :  { %15 = sbr.rel (!%p13_p1) target bundleno = 1 (0x1), region = 75 }
 0x3a6   :  { %1059 = vsyncpa [#allocation3], 1 }
 0x3a7   :  { %1061 = vsyncpa [#allocation3 + $0x1], 1 }

</bundles_post_ra>
